<compile_context>
chip_gen: v7x
topology: tpu7x:2x2x1
jax: 0.10.0
libtpu: 0.0.40
codegen_flags: <defaults>
</compile_context>

<pallas_src>
import functools

import jax
import jax.numpy as jnp
from jax.experimental import pallas as pl
from jax.experimental.pallas import tpu as pltpu


def _fc_relu_kernel(x_ref, w_ref, b_ref, o_ref):
    # x_ref: (tm, K) bf16, w_ref: (K, tn) bf16, b_ref: (1, tn) f32, o_ref: (tm, tn) f32
    acc = jnp.dot(x_ref[...], w_ref[...], preferred_element_type=jnp.float32)
    acc = acc + b_ref[...]                      # broadcast (1, tn) over rows, f32
    o_ref[...] = jnp.maximum(acc, 0.0).astype(o_ref.dtype)


def _round_up(a, b):
    return (a + b - 1) // b * b


def fc7_relu(image, weight_t, bias, *, tm=256, tn=512,
             compute_dtype=jnp.bfloat16):
    """relu(image @ weight_t + bias) via a Pallas kernel.

    image    : (..., in_dim), float32
    weight_t : (in_dim, out_dim)   -- already transposed (PyTorch weight is (out_dim, in_dim))
    bias     : (out_dim,)
    """
    orig_shape = image.shape
    in_dim = orig_shape[-1]
    out_dim = weight_t.shape[1]

    x2d = image.reshape(-1, in_dim)
    M = x2d.shape[0]

    # ---- tile selection -------------------------------------------------
    # Row tile: multiple of 8 sublanes, capped at tm (don't over-pad tiny inputs).
    tm_eff = min(tm, _round_up(M, 8))
    M_pad = _round_up(M, tm_eff)

    # Output lanes: pad to a multiple of 128 and pick the largest lane-dense
    # tile (multiple of 128, <= tn) that divides the padded width.
    N_pad = _round_up(out_dim, 128)
    tn_eff = 128
    for cand in range(min(tn, N_pad), 127, -128):
        if cand % 128 == 0 and N_pad % cand == 0:
            tn_eff = cand
            break

    # ---- pad / cast operands -------------------------------------------
    x_p = jnp.zeros((M_pad, in_dim), compute_dtype)
    x_p = x_p.at[:M, :].set(x2d.astype(compute_dtype))

    w_p = jnp.zeros((in_dim, N_pad), compute_dtype)
    w_p = w_p.at[:, :out_dim].set(weight_t.astype(compute_dtype))

    b_p = jnp.zeros((1, N_pad), jnp.float32)
    b_p = b_p.at[:, :out_dim].set(bias.astype(jnp.float32)[None, :])

    grid = (M_pad // tm_eff, N_pad // tn_eff)

    out = pl.pallas_call(
        _fc_relu_kernel,
        out_shape=jax.ShapeDtypeStruct((M_pad, N_pad), image.dtype),
        grid_spec=pltpu.PrefetchScalarGridSpec(
            num_scalar_prefetch=0,
            grid=grid,
            in_specs=[
                pl.BlockSpec((tm_eff, in_dim), lambda i, j: (i, 0)),   # x row tile, full K
                pl.BlockSpec((in_dim, tn_eff), lambda i, j: (0, j)),   # weight column tile
                pl.BlockSpec((1, tn_eff), lambda i, j: (0, j)),        # bias column tile
            ],
            out_specs=pl.BlockSpec((tm_eff, tn_eff), lambda i, j: (i, j)),
        ),
        compiler_params=pltpu.CompilerParams(
            dimension_semantics=("parallel", "parallel"),
            vmem_limit_bytes=48 * 1024 * 1024,   # safe on v7x (64 MiB physical)
        ),
    )(x_p, w_p, b_p)

    out = out[:M, :out_dim]
    return out.reshape(*orig_shape[:-1], out_dim)


class ImageFeatureEncoderPallas:
    """Mirrors ImageFeatureEncoder(encoder_type='finetune_faster_rcnn_fpn_fc7').

    Weights are initialized deterministically in-script (synthetic) instead of
    loading fc7_w.pkl / fc7_b.pkl.  The weight is stored pre-transposed as
    (in_dim, out_dim) and pre-cast to bf16 so no per-call HBM transpose/cast is
    needed.
    """

    def __init__(self, in_dim, out_dim, key):
        kw, kb = jax.random.split(key)
        # nn.Linear weight convention is (out_dim, in_dim); transpose ONCE at init.
        w = jax.random.normal(kw, (out_dim, in_dim), jnp.float32) * 0.05
        self.weight_t = jnp.asarray(w.T)                     # (in_dim, out_dim), f32 (reference)
        self.weight_c = self.weight_t.astype(jnp.bfloat16)   # compute copy for the MXU
        self.bias = jax.random.normal(kb, (out_dim,), jnp.float32) * 0.05
        self.in_dim = in_dim
        self.out_dim = out_dim
        self._fwd = functools.partial(fc7_relu)

    def __call__(self, image):
        return self._fwd(image, self.weight_c, self.bias)


if __name__ == "__main__":
    key = jax.random.PRNGKey(0)
    k_x, k_p = jax.random.split(key)

    B, S, IN_DIM, OUT_DIM = 2, 8, 32, 32        # small demo shapes: (batch, boxes, feat)
    image = jax.random.normal(k_x, (B, S, IN_DIM), jnp.float32)

    enc = ImageFeatureEncoderPallas(IN_DIM, OUT_DIM, k_p)

    out = enc(image)
    out = jax.block_until_ready(out)

    # Correctness check vs plain-JAX reference of the PyTorch forward, with the
    # same bf16 operand rounding the kernel applies (f32 accumulation).
    x_ref = image.astype(jnp.bfloat16).astype(jnp.float32)
    w_ref = enc.weight_t.astype(jnp.bfloat16).astype(jnp.float32)
    ref = jnp.maximum(x_ref @ w_ref + enc.bias, 0.0)

    assert out.shape == (B, S, OUT_DIM)
    assert jnp.allclose(out, ref, atol=1e-4, rtol=1e-4), float(jnp.max(jnp.abs(out - ref)))

    print("KERNEL_OK")
</pallas_src>

<mosaic_0001>
module attributes {stable_mosaic.version = 11 : i64} {
  func.func @_fc_relu_kernel(%arg0: i32, %arg1: i32, %arg2: memref<16x32xbf16, #tpu.memory_space<vmem>>, %arg3: memref<32x128xbf16, #tpu.memory_space<vmem>>, %arg4: memref<1x128xf32, #tpu.memory_space<vmem>>, %arg5: memref<16x128xf32, #tpu.memory_space<vmem>>) attributes {dimension_semantics = [#tpu.dimension_semantics<parallel>, #tpu.dimension_semantics<parallel>], iteration_bounds = array<i64: 1, 1>, scalar_prefetch = 0 : i64, scratch_operands = 0 : i64, tpu.core_type = #tpu.core_type<tc>, window_params = [{transform_indices = @transform_0, window_bounds = array<i64: 16, 32>}, {transform_indices = @transform_1, window_bounds = array<i64: 32, 128>}, {transform_indices = @transform_2, window_bounds = array<i64: 1, 128>}, {transform_indices = @transform_3, window_bounds = array<i64: 16, 128>}]} {
    %c0 = arith.constant 0 : index
    %c0_0 = arith.constant 0 : index
    %0 = vector.load %arg2[%c0, %c0_0] : memref<16x32xbf16, #tpu.memory_space<vmem>>, vector<16x32xbf16>
    %c0_1 = arith.constant 0 : index
    %c0_2 = arith.constant 0 : index
    %1 = vector.load %arg3[%c0_1, %c0_2] : memref<32x128xbf16, #tpu.memory_space<vmem>>, vector<32x128xbf16>
    %cst = arith.constant dense<0.000000e+00> : vector<16x128xf32>
    %2 = tpu.matmul %0, %1, %cst {dimension_numbers = #tpu.dot_dimension_numbers<[1], [0], [0], [1], [0, 0, 1, 1], [], []>} : vector<16x32xbf16>, vector<32x128xbf16>, vector<16x128xf32> -> vector<16x128xf32>
    %c0_3 = arith.constant 0 : index
    %c0_4 = arith.constant 0 : index
    %3 = vector.load %arg4[%c0_3, %c0_4] : memref<1x128xf32, #tpu.memory_space<vmem>>, vector<1x128xf32>
    %4 = vector.broadcast %3 : vector<1x128xf32> to vector<16x128xf32>
    %5 = arith.addf %2, %4 : vector<16x128xf32>
    %cst_5 = arith.constant 0.000000e+00 : f32
    %6 = vector.broadcast %cst_5 : f32 to vector<16x128xf32>
    %7 = arith.maximumf %5, %6 : vector<16x128xf32>
    %c0_6 = arith.constant 0 : index
    %c0_7 = arith.constant 0 : index
    %8 = vector.load %arg5[%c0_6, %c0_7] : memref<16x128xf32, #tpu.memory_space<vmem>>, vector<16x128xf32>
    tpu.vector_store %arg5[%c0_6, %c0_7], %7 {strides = array<i32>} : memref<16x128xf32, #tpu.memory_space<vmem>>, vector<16x128xf32>,
    return
  }
  func.func @transform_0(%arg0: i32, %arg1: i32) -> (i32, i32) {
    %c0_i32 = arith.constant 0 : i32
    %c0_i32_0 = arith.constant 0 : i32
    return %arg0, %c0_i32 : i32, i32
  }
  func.func @transform_1(%arg0: i32, %arg1: i32) -> (i32, i32) {
    %c0_i32 = arith.constant 0 : i32
    %c0_i32_0 = arith.constant 0 : i32
    return %c0_i32, %arg1 : i32, i32
  }
  func.func @transform_2(%arg0: i32, %arg1: i32) -> (i32, i32) {
    %c0_i32 = arith.constant 0 : i32
    %c0_i32_0 = arith.constant 0 : i32
    return %c0_i32, %arg1 : i32, i32
  }
  func.func @transform_3(%arg0: i32, %arg1: i32) -> (i32, i32) {
    %c0_i32 = arith.constant 0 : i32
    return %arg0, %arg1 : i32, i32
  }
}

</mosaic_0001>

<bundles_post_ra>
// kernel: tpu_custom_call.1
= control target key start
LH: loop header
LB: loop body
LE: loop exit
PB: predicated region body
PF: predicated region fallthrough
CT: control target
= control target key end

     0   :  { %8 = vsyncpa [#allocation3], 0  ;;  %s309_s0 = inlined_call_operand.hbm [shape: bf16[16,32], index: 0, kind: input, shape index: {}]   ;;  %s310_s1 = inlined_call_operand.hbm [shape: bf16[32,128], index: 1, kind: input, shape index: {}]   ;;  %s311_s2 = inlined_call_operand.vmem [shape: f32[1,128], index: 2, kind: input, shape index: {}]   ;;  %s312_s3 = inlined_call_operand.hbm [shape: f32[16,128], index: 3, kind: output, shape index: {}]  }
   0x1   :  { %9 = vsyncpa [#allocation6], 0 }
   0x2   :  { %10 = vsyncpa [#allocation4], 0  ;;  %s241_s12 = smov [#allocation2]   ;;  %s169_s16 = scalar_lea.hbm %s309_s0, 128 }
   0x3   :  { %s16_s13 = sshll.u32 %s241_s12, 4  ;;  %p170_p0 = scmp.ne.s32.totalorder %s309_s0, %s169_s16  ;;  %s17_s13 = int_to_ptr.vmem [resolvable:$true] %s16_s13 }
   0x4   :  { %p173_p1 = scmp.lt.u32.totalorder %s169_s16, %s309_s0 }
   0x6   :  { %p175_p2 = pnand %p173_p1, %p170_p0 }
   0x8   :  { %178 = shalt.err (!%p175_p2)
}
   0x9   :  { %s179_s21 = scalar_lea.vmem %s17_s13, 128  ;;  %p184_p4 = scmp.lt.s32.totalorder %s17_s13, %s17_s13 }
   0xa   :  { %p180_p3 = scmp.ne.s32.totalorder %s17_s13, %s179_s21  ;;  %p185_p5 = scmp.lt.s32.totalorder %s179_s21, %s179_s21 }
   0xc   :  { %p186_p6 = por %p185_p5, %p184_p4 }
   0xe   :  { %p187_p7 = pnand %p186_p6, %p180_p3 }
  0x10   :  { %190 = shalt.err (!%p187_p7)
}
  0x11   :  { %s242_s22 = smov 64   ;;  %s243_s23 = smov 4  }
  0x12   :  { %22 = dma.hbm_to_vmem [thread:$0]  %s309_s0, 128, %s17_s13, [#allocation3], %s242_s22, %s242_s22, %s243_s23  }
  0x13   :  { %s244_s26 = smov [#allocation5]   ;;  %s191_s30 = scalar_lea.hbm %s310_s1, 256 }
  0x14   :  { %s28_s27 = sshll.u32 %s244_s26, 4  ;;  %p192_p8 = scmp.ne.s32.totalorder %s310_s1, %s191_s30  ;;  %s29_s27 = int_to_ptr.vmem [resolvable:$true] %s28_s27 }
  0x15   :  { %p195_p9 = scmp.lt.u32.totalorder %s191_s30, %s310_s1 }
  0x17   :  { %p197_p10 = pnand %p195_p9, %p192_p8 }
  0x19   :  { %200 = shalt.err (!%p197_p10)
}
  0x1a   :  { %s201_s8 = scalar_lea.vmem %s29_s27, 256  ;;  %p206_p12 = scmp.lt.s32.totalorder %s29_s27, %s29_s27 }
  0x1b   :  { %p202_p11 = scmp.ne.s32.totalorder %s29_s27, %s201_s8  ;;  %p207_p13 = scmp.lt.s32.totalorder %s201_s8, %s201_s8 }
  0x1d   :  { %p208_p0 = por %p207_p13, %p206_p12 }
  0x1f   :  { %p209_p1 = pnand %p208_p0, %p202_p11 }
  0x21   :  { %212 = shalt.err (!%p209_p1)
}
  0x22   :  { %34 = dma.hbm_to_vmem [thread:$0]  %s310_s1, 256, %s29_s27, [#allocation6], %s242_s22, %s242_s22, %s243_s23  }
  0x23   :  { %235 = dma.done.wait [#allocation3], 128  }
  0x24   :  { %236 = vsyncadd [#allocation3], 4294967168 }
  0x25   :  { %237 = dma.done.wait [#allocation6], 256  }
  0x26   :  { %238 = vsyncadd [#allocation6], 4294967040  ;;  %v245_v0 = vmov 0.0   ;;  %vm246_vm0 = vmmov 0   ;;  %v166_v1 = vld [vmem:[#allocation5] sm:$0xff]   ;;  %v167_v2 = vld [vmem:[#allocation5 + $0x8] sm:$0xff]  }
  0x27   :  { %149 = vmatprep.subr.bf16.mxu0 %v245_v0  ;;  %153 = vmatprep.mubr.msk.bf16.mxu0 %vm246_vm0, %v245_v0  ;;  %v168_v3 = vld [vmem:[#allocation2] sm:$0xff]   ;;  %vm74_vm1 = vcmask 261120   ;;  %s247_s1 = smov [#allocation7]  }
  0x28   :  { %150 = vmatpush3.bf16.msra.mxu0 %v166_v1  ;;  %v141_v4 = vld [vmem:[%s311_s2] ss:$0 sm:$0xff]  ;;  %s128_s12 = sshll.u32 %s247_s1, 4  ;;  %s129_s12 = int_to_ptr.vmem [resolvable:$true] %s128_s12 }
  0x29   :  { %151 = vmatprep.subr.bf16.mxu0 %v245_v0  ;;  %s213_s13 = scalar_lea.vmem %s129_s12, 256  ;;  %p218_p3 = scmp.lt.s32.totalorder %s129_s12, %s129_s12 }
  0x2a   :  { %p214_p2 = scmp.ne.s32.totalorder %s129_s12, %s213_s13  ;;  %p219_p4 = scmp.lt.s32.totalorder %s213_s13, %s213_s13 }
  0x2c   :  { %152 = vmatpush3.bf16.msra.mxu0 %v167_v2  ;;  %p220_p5 = por %p219_p4, %p218_p3 }
  0x2e   :  { %p221_p6 = pnand %p220_p5, %p214_p2 }
  0x2f   :  { %154 = vmatmul.mubr.msk.bf16.vlgmr.msra.gmra.mrb[0].mxu0 %vm74_vm1, %v168_v3 }
 0x102   :  { %v112_v5 = vpop.f32.mrb[0].mxu0 }
 0x103   :  { %v113_v6 = vadd.f32 %v141_v4, %v112_v5  ;;  %v155_v7 = vpop.f32.mrb[1].mxu0 }
 0x104   :  { %v115_v8 = vpop.f32.mrb[2].mxu0 }
 0x105   :  { %v119_v9 = vmax.f32 %v113_v6, 0.0  ;;  %v116_v10 = vadd.f32 %v141_v4, %v115_v8  ;;  %v156_v11 = vpop.f32.mrb[3].mxu0 }
 0x107   :  { %121 = vst [vmem:[#allocation7] sm:$0xff] %v119_v9  ;;  %v120_v12 = vmax.f32 %v116_v10, 0.0 }
 0x109   :  { %122 = vst [vmem:[#allocation7 + $0x8] sm:$0xff] %v120_v12 }
 0x10a   :  { %224 = shalt.err (!%p221_p6)
}
 0x10b   :  { %s225_s15 = scalar_lea.hbm %s312_s3, 256 }
 0x10c   :  { %p226_p7 = scmp.ne.s32.totalorder %s312_s3, %s225_s15  ;;  %p229_p8 = scmp.lt.u32.totalorder %s225_s15, %s312_s3 }
 0x10e   :  { %p231_p9 = pnand %p229_p8, %p226_p7 }
 0x110   :  { %234 = shalt.err (!%p231_p9)
}
 0x111   :  { %s248_s20 = smov 128   ;;  %s249_s21 = smov 8  }
 0x112   :  { %134 = dma.vmem_to_hbm [thread:$0]  %s129_s12, 256, %s312_s3, [#allocation4], %s248_s20, %s248_s20, %s249_s21  }
 0x113   :  { %239 = dma.done.wait [#allocation4], 256  }
 0x114   :  { %240 = vsyncadd [#allocation4], 4294967040 }
 0x115   :  { %138 = vsyncpa [#allocation3], 1 }
 0x116   :  { %139 = vsyncpa [#allocation6], 1 }
 0x117   :  { %140 = vsyncpa [#allocation4], 1 }

</bundles_post_ra>
